<compile_context>
chip_gen: v6e
topology: v6e:2x2x1
jax: 0.10.0
libtpu: 0.0.40
codegen_flags: <defaults>
</compile_context>

<pallas_src>
import functools

import jax
import jax.numpy as jnp
from jax.experimental import pallas as pl
from jax.experimental.pallas import tpu as pltpu


_LEAKY_SLOPE = 0.01  # PyTorch nn.LeakyReLU default negative_slope.


# ----------------------------------------------------------------------------
# Hardware-aware sizing helpers.
# ----------------------------------------------------------------------------
def _tpu_hw_params():
    """Returns (per-core VMEM capacity bytes, #TensorCores sharing the grid)."""
    vmem_cap = 128 << 20
    try:
        info = pltpu.get_tpu_info()
        cap = int(getattr(info, "vmem_capacity_bytes", 0) or 0)
        if cap > 0:
            vmem_cap = cap
    except Exception:
        pass
    kind = ""
    try:
        kind = jax.devices()[0].device_kind.lower()
    except Exception:
        pass
    # v7x: 2 TensorCores per chip and 64 MiB VMEM per core.
    num_tc = 2 if ("v7" in kind or vmem_cap <= (96 << 20)) else 1
    return vmem_cap, num_tc


def _default_block_bytes(vmem_cap):
    # Budget the x block so double-buffered in + out (+ headroom for
    # compiler-internal scratch / elementwise temps) fits under 80% of VMEM:
    # v5e/v6e (128 MiB) -> ~21 MiB blocks; v7x (64 MiB) -> ~10 MiB blocks.
    cap = int(0.8 * vmem_cap)
    return int(max(2 << 20, min(28 << 20, (cap - (6 << 20)) / 4.5)))


def _vmem_limit_bytes(vmem_cap, *byte_counts):
    est = int(sum(byte_counts)) + (6 << 20)          # + compiler scratch headroom
    return max(16 << 20, min(est, int(0.8 * vmem_cap)))


def _pick_spatial_tile(hw_pad, c, itemsize, block_bytes):
    """Largest multiple of 128 dividing hw_pad (already 128-aligned) under budget."""
    cap = max(128, (block_bytes // max(1, c * itemsize)) // 128 * 128)
    best, t = 128, 128
    while t <= hw_pad and t <= cap:
        if hw_pad % t == 0:
            best = t
        t += 128
    return best


def _pick_batch_tile(b, row_bytes, block_bytes, num_tc):
    bt = max(1, min(b, block_bytes // max(1, row_bytes)))
    if num_tc >= 2 and b >= 2:
        # 2-TC chips (v7x): guarantee >= 2 grid steps along the "parallel"
        # batch axis so both TensorCores get work.  Single-TC chips keep the
        # largest tile that fits (no pointless extra grid steps).
        bt = min(bt, max(1, b // 2))
    while b % bt:
        bt -= 1
    return bt


# ----------------------------------------------------------------------------
# Kernels.
# ----------------------------------------------------------------------------
def _excite(y, w1t, b1, w2t, b2):
    """FC(C->Cr) + LeakyReLU + FC(Cr->C) + Sigmoid on pooled features y:(Bt, C)."""
    h = jnp.dot(y, w1t, preferred_element_type=jnp.float32) + b1
    h = jnp.where(h > 0, h, _LEAKY_SLOPE * h)
    s = jnp.dot(h, w2t, preferred_element_type=jnp.float32) + b2
    return 1.0 / (1.0 + jnp.exp(-s))  # exact sigmoid (f32)


def _se_fused_kernel(x_ref, w1t_ref, b1_ref, w2t_ref, b2_ref, o_ref):
    # x_ref: (Bt, C, HW) — pool, excite and rescale in one pass.
    x = x_ref[...]                                          # stays in input dtype
    y = jnp.mean(x, axis=2, dtype=jnp.float32)              # f32 accumulation
    s = _excite(y, w1t_ref[...], b1_ref[...], w2t_ref[...], b2_ref[...])
    # Rescale in the input dtype (scales cast down) — no f32 copy of the block.
    o_ref[...] = (x * s.astype(x_ref.dtype)[:, :, None]).astype(o_ref.dtype)


def _se_pool_fc_kernel(x_ref, w1t_ref, b1_ref, w2t_ref, b2_ref, s_ref, acc_ref,
                       *, inv_hw):
    # Pass A: accumulate pooled sum over H*W tiles; finalize scales at last tile.
    hw = pl.program_id(1)

    @pl.when(hw == 0)
    def _():
        acc_ref[...] = jnp.zeros_like(acc_ref)

    acc_ref[...] += jnp.sum(x_ref[...], axis=2, dtype=jnp.float32)

    @pl.when(hw == pl.num_programs(1) - 1)
    def _():
        y = acc_ref[...] * inv_hw                           # (Bt, C)
        s = _excite(y, w1t_ref[...], b1_ref[...], w2t_ref[...], b2_ref[...])
        s_ref[...] = s[:, None, :]                          # (Bt, 1, C) lane-dense


def _se_rescale_kernel(x_ref, s_ref, o_ref):
    # Pass B: stream x and apply the per-(b, c) channel scales (input dtype).
    x = x_ref[...]
    s = s_ref[...][:, 0, :].astype(x_ref.dtype)             # (Bt, C)
    o_ref[...] = (x * s[:, :, None]).astype(o_ref.dtype)


# ----------------------------------------------------------------------------
# Wrapper.
# ----------------------------------------------------------------------------
def se_layer(x, w1, b1, w2, b2, *, block_bytes=None, force_two_pass=False,
             donate_x=False):
    """Squeeze-and-Excitation forward.

    x: (B, C, H, W); w1: (C//r, C); b1: (C//r,); w2: (C, C//r); b2: (C,)
    (PyTorch nn.Linear layout).  Returns (B, C, H, W) in x.dtype.
    donate_x=True aliases the output onto x (only profitable if the caller
    actually donates x; otherwise XLA inserts a defensive copy).
    """
    B, C, H, W = x.shape
    HW = H * W
    Cr = w1.shape[0]
    itemsize = jnp.dtype(x.dtype).itemsize

    vmem_cap, num_tc = _tpu_hw_params()
    if block_bytes is None:
        block_bytes = _default_block_bytes(vmem_cap)

    x_flat = x.reshape(B, C, HW)
    # Pre-transpose the tiny FC weights once so the kernels do plain row-major dots.
    w1t = jnp.asarray(w1, jnp.float32).T            # (C, Cr)
    w2t = jnp.asarray(w2, jnp.float32).T            # (Cr, C)
    b1r = jnp.asarray(b1, jnp.float32).reshape(1, Cr)
    b2r = jnp.asarray(b2, jnp.float32).reshape(1, C)
    params_bytes = 4 * (w1t.size + w2t.size + b1r.size + b2r.size)

    slab_bytes = C * HW * itemsize                  # one batch row of x
    aliases = {0: 0} if donate_x else {}

    if not force_two_pass and slab_bytes <= block_bytes:
        # --- Fused single pass: (Bt, C, HW) per grid step (1x read + 1x write).
        bt = _pick_batch_tile(B, slab_bytes, block_bytes, num_tc)
        nb = B // bt
        xblk = bt * slab_bytes
        out = pl.pallas_call(
            _se_fused_kernel,
            out_shape=jax.ShapeDtypeStruct((B, C, HW), x.dtype),
            grid_spec=pltpu.PrefetchScalarGridSpec(
                num_scalar_prefetch=0,
                grid=(nb,),
                in_specs=[
                    pl.BlockSpec((bt, C, HW), lambda b: (b, 0, 0)),
                    pl.BlockSpec((C, Cr), lambda b: (0, 0)),
                    pl.BlockSpec((1, Cr), lambda b: (0, 0)),
                    pl.BlockSpec((Cr, C), lambda b: (0, 0)),
                    pl.BlockSpec((1, C), lambda b: (0, 0)),
                ],
                out_specs=pl.BlockSpec((bt, C, HW), lambda b: (b, 0, 0)),
            ),
            input_output_aliases=aliases,
            compiler_params=pltpu.CompilerParams(
                dimension_semantics=("parallel",),
                vmem_limit_bytes=_vmem_limit_bytes(vmem_cap, 4 * xblk,
                                                   params_bytes),
            ),
        )(x_flat, w1t, b1r, w2t, b2r)
        return out.reshape(B, C, H, W)

    # --- Two-pass path: VMEM bounded independent of H*W.
    # Pad H*W to a multiple of 128 so tiles are lane-dense; zero padding does
    # not affect the pooled sum (the mean divides by the true HW).
    HWp = ((HW + 127) // 128) * 128
    x_work = x_flat if HWp == HW else jnp.pad(
        x_flat, ((0, 0), (0, 0), (0, HWp - HW)))

    thw = _pick_spatial_tile(HWp, C, itemsize, block_bytes)
    row_bytes = C * thw * itemsize
    bt = _pick_batch_tile(B, row_bytes, block_bytes, num_tc)
    nb, nhw = B // bt, HWp // thw
    xblk = bt * row_bytes

    # Pass A: pooled mean + FC stack -> per-(b, c) scales, lane-dense (B, 1, C).
    scales = pl.pallas_call(
        functools.partial(_se_pool_fc_kernel, inv_hw=1.0 / HW),
        out_shape=jax.ShapeDtypeStruct((B, 1, C), jnp.float32),
        grid_spec=pltpu.PrefetchScalarGridSpec(
            num_scalar_prefetch=0,
            grid=(nb, nhw),
            in_specs=[
                pl.BlockSpec((bt, C, thw), lambda b, h: (b, 0, h)),
                pl.BlockSpec((C, Cr), lambda b, h: (0, 0)),
                pl.BlockSpec((1, Cr), lambda b, h: (0, 0)),
                pl.BlockSpec((Cr, C), lambda b, h: (0, 0)),
                pl.BlockSpec((1, C), lambda b, h: (0, 0)),
            ],
            out_specs=pl.BlockSpec((bt, 1, C), lambda b, h: (b, 0, 0)),
            scratch_shapes=[pltpu.VMEM((bt, C), jnp.float32)],
        ),
        compiler_params=pltpu.CompilerParams(
            dimension_semantics=("parallel", "arbitrary"),
            vmem_limit_bytes=_vmem_limit_bytes(vmem_cap, 2 * xblk, params_bytes,
                                               8 * bt * C * 4),
        ),
    )(x_work, w1t, b1r, w2t, b2r)

    # Pass B: stream x and rescale with fully parallel, lane-dense tiles.
    out = pl.pallas_call(
        _se_rescale_kernel,
        out_shape=jax.ShapeDtypeStruct((B, C, HWp), x.dtype),
        grid_spec=pltpu.PrefetchScalarGridSpec(
            num_scalar_prefetch=0,
            grid=(nb, nhw),
            in_specs=[
                pl.BlockSpec((bt, C, thw), lambda b, h: (b, 0, h)),
                pl.BlockSpec((bt, 1, C), lambda b, h: (b, 0, 0)),
            ],
            out_specs=pl.BlockSpec((bt, C, thw), lambda b, h: (b, 0, h)),
        ),
        input_output_aliases=aliases,
        compiler_params=pltpu.CompilerParams(
            dimension_semantics=("parallel", "parallel"),
            vmem_limit_bytes=_vmem_limit_bytes(vmem_cap, 4 * xblk,
                                               4 * bt * C * 4),
        ),
    )(x_work, scales)

    if HWp != HW:
        out = out[:, :, :HW]
    return out.reshape(B, C, H, W)


def _reference(x, w1, b1, w2, b2):
    y = jnp.mean(x, axis=(2, 3))
    h = y @ w1.T + b1
    h = jnp.where(h > 0, h, _LEAKY_SLOPE * h)
    s = 1.0 / (1.0 + jnp.exp(-(h @ w2.T + b2)))
    return x * s[:, :, None, None]


if __name__ == "__main__":
    # inp_dim must be > reduction (=16): C=32 -> hidden Cr=2.
    B, C, H, W = 2, 32, 16, 16
    reduction = 16
    Cr = C // reduction

    key = jax.random.PRNGKey(0)
    kx, k1, k2, k3, k4 = jax.random.split(key, 5)

    x = jax.random.normal(kx, (B, C, H, W), dtype=jnp.float32)
    # nn.Linear layouts: weight (out, in), bias (out,).
    w1 = jax.random.normal(k1, (Cr, C), dtype=jnp.float32) * 0.1
    b1 = jax.random.normal(k2, (Cr,), dtype=jnp.float32) * 0.1
    w2 = jax.random.normal(k3, (C, Cr), dtype=jnp.float32) * 0.1
    b2 = jax.random.normal(k4, (C,), dtype=jnp.float32) * 0.1

    ref = _reference(x, w1, b1, w2, b2)

    # Fused path (whole (Bt, C, H*W) slab fits the generation-aware block budget).
    out_fused = jax.block_until_ready(se_layer(x, w1, b1, w2, b2))
    assert out_fused.shape == (B, C, H, W)
    assert jnp.allclose(out_fused, ref, atol=1e-5, rtol=1e-5), "fused path mismatch"

    # Two-pass path, forced with a tiny block budget so both B and H*W get tiled.
    out_split = jax.block_until_ready(
        se_layer(x, w1, b1, w2, b2, block_bytes=16 << 10, force_two_pass=True))
    assert jnp.allclose(out_split, ref, atol=1e-5, rtol=1e-5), "two-pass path mismatch"

    # Non-128-aligned H*W: fused uses the full-HW (masked-store) block; the
    # two-pass path exercises the pad-to-128 + slice wrapper logic.
    x2 = jax.random.normal(kx, (B, C, 10, 10), dtype=jnp.float32)
    ref2 = _reference(x2, w1, b1, w2, b2)
    out2_f = jax.block_until_ready(se_layer(x2, w1, b1, w2, b2))
    assert jnp.allclose(out2_f, ref2, atol=1e-5, rtol=1e-5), "fused odd-HW mismatch"
    out2_s = jax.block_until_ready(
        se_layer(x2, w1, b1, w2, b2, block_bytes=16 << 10, force_two_pass=True))
    assert jnp.allclose(out2_s, ref2, atol=1e-5, rtol=1e-5), "two-pass odd-HW mismatch"

    print("KERNEL_OK")
</pallas_src>

<mosaic_0001>
module attributes {stable_mosaic.version = 11 : i64} {
  func.func @_se_fused_kernel(%arg0: i32, %arg1: memref<2x32x256xf32, #tpu.memory_space<vmem>>, %arg2: memref<32x2xf32, #tpu.memory_space<vmem>>, %arg3: memref<1x2xf32, #tpu.memory_space<vmem>>, %arg4: memref<2x32xf32, #tpu.memory_space<vmem>>, %arg5: memref<1x32xf32, #tpu.memory_space<vmem>>, %arg6: memref<2x32x256xf32, #tpu.memory_space<vmem>>) attributes {dimension_semantics = [#tpu.dimension_semantics<parallel>], iteration_bounds = array<i64: 1>, scalar_prefetch = 0 : i64, scratch_operands = 0 : i64, tpu.core_type = #tpu.core_type<tc>, window_params = [{transform_indices = @transform_0, window_bounds = array<i64: 2, 32, 256>}, {pipeline_mode = #tpu.pipeline_mode<synchronous>, transform_indices = @transform_1, window_bounds = array<i64: 32, 2>}, {pipeline_mode = #tpu.pipeline_mode<synchronous>, transform_indices = @transform_2, window_bounds = array<i64: 1, 2>}, {pipeline_mode = #tpu.pipeline_mode<synchronous>, transform_indices = @transform_3, window_bounds = array<i64: 2, 32>}, {pipeline_mode = #tpu.pipeline_mode<synchronous>, transform_indices = @transform_4, window_bounds = array<i64: 1, 32>}, {transform_indices = @transform_5, window_bounds = array<i64: 2, 32, 256>}]} {
    %c0 = arith.constant 0 : index
    %c0_0 = arith.constant 0 : index
    %c0_1 = arith.constant 0 : index
    %0 = vector.load %arg1[%c0, %c0_0, %c0_1] : memref<2x32x256xf32, #tpu.memory_space<vmem>>, vector<2x32x256xf32>
    %cst = arith.constant dense<0.000000e+00> : vector<2x32xf32>
    %1 = vector.multi_reduction <add>, %0, %cst [2] : vector<2x32x256xf32> to vector<2x32xf32>
    %cst_2 = arith.constant 2.560000e+02 : f32
    %2 = vector.broadcast %cst_2 : f32 to vector<2x32xf32>
    %3 = arith.divf %1, %2 : vector<2x32xf32>
    %c0_3 = arith.constant 0 : index
    %c0_4 = arith.constant 0 : index
    %4 = vector.load %arg2[%c0_3, %c0_4] : memref<32x2xf32, #tpu.memory_space<vmem>>, vector<32x2xf32>
    %c0_5 = arith.constant 0 : index
    %c0_6 = arith.constant 0 : index
    %5 = vector.load %arg3[%c0_5, %c0_6] : memref<1x2xf32, #tpu.memory_space<vmem>>, vector<1x2xf32>
    %c0_7 = arith.constant 0 : index
    %c0_8 = arith.constant 0 : index
    %6 = vector.load %arg4[%c0_7, %c0_8] : memref<2x32xf32, #tpu.memory_space<vmem>>, vector<2x32xf32>
    %c0_9 = arith.constant 0 : index
    %c0_10 = arith.constant 0 : index
    %7 = vector.load %arg5[%c0_9, %c0_10] : memref<1x32xf32, #tpu.memory_space<vmem>>, vector<1x32xf32>
    %cst_11 = arith.constant dense<0.000000e+00> : vector<2x2xf32>
    %8 = tpu.matmul %3, %4, %cst_11 {dimension_numbers = #tpu.dot_dimension_numbers<[1], [0], [0], [1], [0, 0, 1, 1], [], []>} : vector<2x32xf32>, vector<32x2xf32>, vector<2x2xf32> -> vector<2x2xf32>
    %9 = vector.broadcast %5 : vector<1x2xf32> to vector<2x2xf32>
    %10 = arith.addf %8, %9 : vector<2x2xf32>
    %cst_12 = arith.constant 0.000000e+00 : f32
    %11 = vector.broadcast %cst_12 : f32 to vector<2x2xf32>
    %12 = arith.cmpf ogt, %10, %11 : vector<2x2xf32>
    %cst_13 = arith.constant 0.00999999977 : f32
    %13 = vector.broadcast %cst_13 : f32 to vector<2x2xf32>
    %14 = arith.mulf %13, %10 : vector<2x2xf32>
    %15 = arith.select %12, %10, %14 : vector<2x2xi1>, vector<2x2xf32>
    %cst_14 = arith.constant dense<0.000000e+00> : vector<2x32xf32>
    %16 = tpu.matmul %15, %6, %cst_14 {dimension_numbers = #tpu.dot_dimension_numbers<[1], [0], [0], [1], [0, 0, 1, 1], [], []>} : vector<2x2xf32>, vector<2x32xf32>, vector<2x32xf32> -> vector<2x32xf32>
    %17 = vector.broadcast %7 : vector<1x32xf32> to vector<2x32xf32>
    %18 = arith.addf %16, %17 : vector<2x32xf32>
    %cst_15 = arith.constant 0.000000e+00 : f32
    %19 = vector.broadcast %cst_15 : f32 to vector<2x32xf32>
    %20 = arith.subf %19, %18 : vector<2x32xf32>
    %21 = math.exp %20 : vector<2x32xf32>
    %cst_16 = arith.constant 1.000000e+00 : f32
    %22 = vector.broadcast %cst_16 : f32 to vector<2x32xf32>
    %23 = arith.addf %22, %21 : vector<2x32xf32>
    %cst_17 = arith.constant 1.000000e+00 : f32
    %24 = vector.broadcast %cst_17 : f32 to vector<2x32xf32>
    %25 = arith.divf %24, %23 : vector<2x32xf32>
    %26 = vector.shape_cast %25 : vector<2x32xf32> to vector<2x32x1xf32>
    %27 = vector.broadcast %26 : vector<2x32x1xf32> to vector<2x32x256xf32>
    %28 = arith.mulf %0, %27 : vector<2x32x256xf32>
    %c0_18 = arith.constant 0 : index
    %c0_19 = arith.constant 0 : index
    %c0_20 = arith.constant 0 : index
    %29 = vector.load %arg6[%c0_18, %c0_19, %c0_20] : memref<2x32x256xf32, #tpu.memory_space<vmem>>, vector<2x32x256xf32>
    tpu.vector_store %arg6[%c0_18, %c0_19, %c0_20], %28 {strides = array<i32>} : memref<2x32x256xf32, #tpu.memory_space<vmem>>, vector<2x32x256xf32>,
    return
  }
  func.func @transform_0(%arg0: i32) -> (i32, i32, i32) {
    %c0_i32 = arith.constant 0 : i32
    %c0_i32_0 = arith.constant 0 : i32
    %c0_i32_1 = arith.constant 0 : i32
    return %arg0, %c0_i32, %c0_i32_0 : i32, i32, i32
  }
  func.func @transform_1(%arg0: i32) -> (i32, i32) {
    %c0_i32 = arith.constant 0 : i32
    %c0_i32_0 = arith.constant 0 : i32
    %c0_i32_1 = arith.constant 0 : i32
    return %c0_i32, %c0_i32_0 : i32, i32
  }
  func.func @transform_2(%arg0: i32) -> (i32, i32) {
    %c0_i32 = arith.constant 0 : i32
    %c0_i32_0 = arith.constant 0 : i32
    %c0_i32_1 = arith.constant 0 : i32
    return %c0_i32, %c0_i32_0 : i32, i32
  }
  func.func @transform_3(%arg0: i32) -> (i32, i32) {
    %c0_i32 = arith.constant 0 : i32
    %c0_i32_0 = arith.constant 0 : i32
    %c0_i32_1 = arith.constant 0 : i32
    return %c0_i32, %c0_i32_0 : i32, i32
  }
  func.func @transform_4(%arg0: i32) -> (i32, i32) {
    %c0_i32 = arith.constant 0 : i32
    %c0_i32_0 = arith.constant 0 : i32
    %c0_i32_1 = arith.constant 0 : i32
    return %c0_i32, %c0_i32_0 : i32, i32
  }
  func.func @transform_5(%arg0: i32) -> (i32, i32, i32) {
    %c0_i32 = arith.constant 0 : i32
    %c0_i32_0 = arith.constant 0 : i32
    %c0_i32_1 = arith.constant 0 : i32
    return %arg0, %c0_i32, %c0_i32_0 : i32, i32, i32
  }
}

</mosaic_0001>

<bundles_post_ra>
// kernel: tpu_custom_call.1
= control target key start
LH: loop header
LB: loop body
LE: loop exit
PB: predicated region body
PF: predicated region fallthrough
CT: control target
= control target key end

     0   :  { %10 = vsyncpa [#allocation3], 0  ;;  %s629_s0 = inlined_call_operand.hbm [shape: f32[2,32,256], index: 0, kind: input, shape index: {}]   ;;  %s630_s1 = inlined_call_operand.vmem [shape: f32[32,2], index: 1, kind: input, shape index: {}]   ;;  %s631_s2 = inlined_call_operand.vmem [shape: f32[1,2], index: 2, kind: input, shape index: {}]   ;;  %s632_s3 = inlined_call_operand.vmem [shape: f32[2,32], index: 3, kind: input, shape index: {}]   ;;  %s633_s4 = inlined_call_operand.vmem [shape: f32[1,32], index: 4, kind: input, shape index: {}]   ;;  %s634_s5 = inlined_call_operand.hbm [shape: f32[2,32,256], index: 5, kind: output, shape index: {}]  }
   0x1   :  { %11 = vsyncpa [#allocation4], 0  ;;  %s488_s18 = smov [#allocation2]  }
   0x2   :  { %s17_s19 = sshll.u32 %s488_s18, 4  ;;  %s18_s19 = int_to_ptr.vmem [resolvable:$true] %s17_s19 }
   0x3   :  { %s452_s20 = scalar_lea.vmem %s18_s19, 2048  ;;  %p457_p1 = scmp.lt.s32.totalorder %s18_s19, %s18_s19 }
   0x4   :  { %p453_p0 = scmp.ne.s32.totalorder %s18_s19, %s452_s20  ;;  %p458_p2 = scmp.lt.s32.totalorder %s452_s20, %s452_s20 }
   0x6   :  { %p459_p3 = por %p458_p2, %p457_p1 }
   0x8   :  { %p460_p4 = pnand %p459_p3, %p453_p0 }
   0xa   :  { %463 = shalt.err (!%p460_p4)
}
   0xb   :  { %s489_s21 = smov 256   ;;  %s490_s22 = smov 16  }
   0xc   :  { %23 = dma.hbm_to_vmem [thread:$0]  %s629_s0, 2048, %s18_s19, [#allocation3], %s489_s21, %s489_s21, %s490_s22  }
   0xd   :  { %484 = dma.done.wait [#allocation3], 2048  }
   0xe   :  { %485 = vsyncadd [#allocation3], 4294965248  ;;  %v530_v0 = vld [vmem:[#allocation2 + $0x40] sm:$0xff]  ;;  %v532_v1 = vld [vmem:[#allocation2 + $0x48] sm:$0xff]  ;;  %v491_v24 = vmov 0.0   ;;  %vm492_vm0 = vmmov 0   ;;  %v105_v29 = vlaneseq }
   0xf   :  { %v534_v2 = vld [vmem:[#allocation2] sm:$0xff]  ;;  %v63_v3 = vadd.f32 %v532_v1, %v530_v0  ;;  %v538_v4 = vld [vmem:[#allocation2 + $0x8] sm:$0xff]  ;;  %v540_v5 = vld [vmem:[#allocation2 + $0x50] sm:$0xff]  ;;  %418 = vmatprep.subr.mxu0 %v491_v24  ;;  %429 = vmatprep.subr.mxu1 %v491_v24  ;;  %vm116_vm1 = vcmask 130112   ;;  %vm123_vm2 = vcmask 195712   ;;  %vm130_vm3 = vcmask 261312  }
  0x10   :  { %v542_v6 = vld [vmem:[#allocation2 + $0x58] sm:$0xff]  ;;  %v51_v7 = vadd.f32 %v538_v4, %v534_v2  ;;  %v546_v8 = vld [vmem:[#allocation2 + $0x10] sm:$0xff]  ;;  %v554_v12 = vld [vmem:[#allocation2 + $0x60] sm:$0xff]  ;;  %426 = vmatprep.mubr.msk.f32.mxu0 %vm492_vm0, %v491_v24  ;;  %431 = vmatprep.mubr.msk.f32.mxu1 %vm492_vm0, %v491_v24  ;;  %v106_v31 = vand.u32 127, %v105_v29  ;;  %v590_v36 = vshrl.u32 %v105_v29, 7  ;;  %vm151_vm4 = vcmask 1041409  }
  0x11   :  { %v548_v9 = vld [vmem:[#allocation2 + $0x18] sm:$0xff]  ;;  %64 = vadd.xlane.f32.xlu1 %v63_v3  ;;  %v66_v10 = vadd.f32 %v542_v6, %v540_v5  ;;  %v556_v13 = vld [vmem:[#allocation2 + $0x68] sm:$0xff]  ;;  %v558_v14 = vld [vmem:[#allocation2 + $0x20] sm:$0xff]  ;;  %vm153_vm5 = vcmask 261120   ;;  %vm239_vm6 = vcmask 1041408   ;;  %vm235_vm8 = vcmask 15360  }
  0x12   :  { %52 = vadd.xlane.f32.xlu0 %v51_v7  ;;  %v54_v11 = vadd.f32 %v548_v9, %v546_v8  ;;  %v560_v15 = vld [vmem:[#allocation2 + $0x28] sm:$0xff]  ;;  %v69_v16 = vadd.f32 %v556_v13, %v554_v12  ;;  %v566_v18 = vld [vmem:[#allocation2 + $0x70] sm:$0xff]  ;;  %v568_v19 = vld [vmem:[#allocation2 + $0x78] sm:$0xff]  ;;  %v111_v33 = vadd.s32 4294967288, %v106_v31  ;;  %v118_v35 = vadd.s32 4294967280, %v106_v31 }
  0x13   :  { %v57_v17 = vadd.f32 %v560_v15, %v558_v14  ;;  %v570_v20 = vld [vmem:[#allocation2 + $0x30] sm:$0xff]  ;;  %v572_v21 = vld [vmem:[#allocation2 + $0x38] sm:$0xff]  ;;  %v72_v22 = vadd.f32 %v568_v19, %v566_v18  ;;  %v85_v27 = vld [vmem:[%s630_s1 + $0x8] sm:$0xff]  ;;  %v125_v40 = vadd.s32 4294967272, %v106_v31  ;;  %v109_v44 = vsub.s32 %v106_v31, %v590_v36 }
  0x14   :  { %v60_v23 = vadd.f32 %v572_v21, %v570_v20  ;;  %v87_v25 = vld [vmem:[%s630_s1 + $0x18] sm:$0xff]  ;;  %v86_v26 = vld [vmem:[%s630_s1 + $0x10] sm:$0xff]  ;;  %v84_v28 = vld [vmem:[%s630_s1] sm:$0xff]  ;;  %v114_v38 = vsub.s32 %v111_v33, %v590_v36  ;;  %v121_v42 = vsub.s32 %v118_v35, %v590_v36 }
  0x15   :  { %67 = vadd.xlane.f32.xlu1 %v66_v10  ;;  %419 = vmatpush3.msra.mxu0 %v87_v25  ;;  %v128_v51 = vsub.s32 %v125_v40, %v590_v36  ;;  %v408_v29 = vld [vmem:[%s633_s4] ss:$0 sm:$0xff] }
  0x16   :  { %55 = vadd.xlane.f32.xlu0 %v54_v11  ;;  %420 = vmatprep.subr.mxu0 %v491_v24 }
  0x17   :  { %421 = vmatpush3.msra.mxu0 %v86_v26 }
  0x18   :  { %422 = vmatprep.subr.mxu0 %v491_v24 }
  0x19   :  { %70 = vadd.xlane.f32.xlu1 %v69_v16  ;;  %423 = vmatpush3.msra.mxu0 %v85_v27 }
  0x1a   :  { %58 = vadd.xlane.f32.xlu0 %v57_v17  ;;  %424 = vmatprep.subr.mxu0 %v491_v24 }
  0x1b   :  { %425 = vmatpush3.msra.mxu0 %v84_v28 }
  0x1d   :  { %73 = vadd.xlane.f32.xlu1 %v72_v22  ;;  %v89_v22 = vld [vmem:[%s632_s3] sm:$0x3] }
  0x1e   :  { %61 = vadd.xlane.f32.xlu0 %v60_v23  ;;  %430 = vmatpush3.msk.msra.mxu1 %vm239_vm6, %v89_v22  ;;  %v406_v23 = vld [vmem:[%s631_s2] ss:$0 sm:$0xff]  ;;  %s493_s2 = smov [#allocation5]  }
  0x1f   :  { %s394_s3 = sshll.u32 %s493_s2, 4  ;;  %s395_s3 = int_to_ptr.vmem [resolvable:$true] %s394_s3 }
  0x20   :  { %s464_s4 = scalar_lea.vmem %s395_s3, 2048  ;;  %p469_p6 = scmp.lt.s32.totalorder %s395_s3, %s395_s3 }
  0x21   :  { %p465_p5 = scmp.ne.s32.totalorder %s395_s3, %s464_s4  ;;  %p470_p7 = scmp.lt.s32.totalorder %s464_s4, %s464_s4 }
  0x23   :  { %p471_p8 = por %p470_p7, %p469_p6 }
  0x25   :  { %p472_p9 = pnand %p471_p8, %p465_p5 }
  0x9a   :  { %v65_v30 = vpop.xlane.xlu1 %64 }
  0x9b   :  { %v53_v32 = vpop.xlane.xlu0 %52  ;;  %v80_v45 = vmul.f32 0.00390625, %v65_v30 }
  0x9c   :  { %v76_v48 = vmul.f32 0.00390625, %v53_v32 }
  0x9d   :  { %v135_v55 = vrot.slane %v80_v45, %v109_v44 }
  0x9e   :  { %v68_v34 = vpop.xlane.xlu1 %67  ;;  %v110_v59 = vrot.slane %v76_v48, %v109_v44 }
  0x9f   :  { %v56_v37 = vpop.xlane.xlu0 %55  ;;  %v81_v39 = vmul.f32 0.00390625, %v68_v34 }
  0xa0   :  { %v77_v41 = vmul.f32 0.00390625, %v56_v37 }
  0xa1   :  { %v139_v50 = vrot.slane %v81_v39, %v114_v38 }
  0xa2   :  { %v71_v43 = vpop.xlane.xlu1 %70  ;;  %v115_v52 = vrot.slane %v77_v41, %v114_v38  ;;  %v321_v38 = vsub.s32 0, %v590_v36  ;;  %v340_v41 = vsub.s32 1, %v590_v36 }
  0xa3   :  { %v82_v46 = vmul.f32 0.00390625, %v71_v43  ;;  %v59_v47 = vpop.xlane.xlu0 %58  ;;  %v140_v61 = vsel %vm116_vm1, %v139_v50, %v135_v55 }
  0xa4   :  { %v78_v49 = vmul.f32 0.00390625, %v59_v47  ;;  %v117_v63 = vsel %vm116_vm1, %v115_v52, %v110_v59 }
  0xa5   :  { %v144_v53 = vrot.slane %v82_v46, %v121_v42 }
  0xa6   :  { %v74_v54 = vpop.xlane.xlu1 %73  ;;  %v122_v56 = vrot.slane %v78_v49, %v121_v42 }
  0xa7   :  { %v83_v57 = vmul.f32 0.00390625, %v74_v54  ;;  %v62_v58 = vpop.xlane.xlu0 %61  ;;  %v145_v3 = vsel %vm123_vm2, %v144_v53, %v140_v61 }
  0xa8   :  { %v79_v60 = vmul.f32 0.00390625, %v62_v58  ;;  %v124_v10 = vsel %vm123_vm2, %v122_v56, %v117_v63 }
  0xa9   :  { %v149_v62 = vrot.slane %v83_v57, %v128_v51 }
  0xaa   :  { %v129_v7 = vrot.slane %v79_v60, %v128_v51 }
  0xab   :  { %v150_v11 = vsel %vm130_vm3, %v149_v62, %v145_v3 }
  0xac   :  { %v131_v16 = vsel %vm130_vm3, %v129_v7, %v124_v10 }
  0xad   :  { %v152_v17 = vsel %vm151_vm4, %v150_v11, %v131_v16 }
  0xae   :  { %427 = vmatmul.mubr.msk.f32.vlgmr.msra.gmra.mxu0 %vm153_vm5, %v152_v17 }
 0x16e   :  { %v222_v24 = vpop.f32.mrf.mxu0 }
 0x16f   :  { %v223_v25 = vadd.f32 %v406_v23, %v222_v24 }
 0x170   :  { %v428_v26 = vpop.f32.mrf.mxu0 }
 0x171   :  { %vm226_vm7 = vcmp.gt.f32.partialorder %v223_v25, 0.0  ;;  %v227_v27 = vmul.f32 0.01, %v223_v25 }
 0x173   :  { %v228_v28 = vsel %vm226_vm7, %v223_v25, %v227_v27 }
 0x174   :  { %432 = vmatmul.mubr.msk.f32.vlgmr.msra.gmra.mxu1 %vm235_vm8, %v228_v28 }
 0x234   :  { %v309_v30 = vpop.f32.mrf.mxu1 }
 0x235   :  { %v310_v31 = vadd.f32 %v408_v29, %v309_v30 }
 0x236   :  { %v433_v32 = vpop.f32.mrf.mxu1 }
 0x237   :  { %v313_v33 = vsub.f32 0.0, %v310_v31 }
 0x239   :  { %v314_v34 = vmul.f32 1.442695, %v313_v33 }
 0x23b   :  { %440 = vpow2.f32 %v314_v34 }
 0x248   :  { %v441_v35 = vpop.eup %440 }
 0x249   :  { %v316_v37 = vadd.f32 1.0, %v441_v35 }
 0x24b   :  { %442 = vrcp.f32 %v316_v37 }
 0x258   :  { %v443_v39 = vpop.eup %442 }
 0x259   :  { %v322_v40 = vrot.slane %v443_v39, %v321_v38  ;;  %v341_v42 = vrot.slane %v443_v39, %v340_v41 }
 0x25b   :  { %328 = vbcast.lane.b32.xlu1 %v322_v40, 264  ;;  %324 = vbcast.lane.b32.xlu0 %v322_v40, 256 }
 0x25f   :  { %332 = vbcast.lane.b32.xlu1 %v322_v40, 272  ;;  %343 = vbcast.lane.b32.xlu0 %v341_v42, 256 }
 0x263   :  { %336 = vbcast.lane.b32.xlu1 %v322_v40, 280  ;;  %351 = vbcast.lane.b32.xlu0 %v341_v42, 272 }
 0x267   :  { %347 = vbcast.lane.b32.xlu1 %v341_v42, 264 }
 0x26b   :  { %355 = vbcast.lane.b32.xlu1 %v341_v42, 280 }
 0x2cd   :  { %v329_v43 = vpop.permute.xlu1 %328  ;;  %v325_v44 = vpop.permute.xlu0 %324 }
 0x2ce   :  { %v359_v45 = vmul.f32 %v329_v43, %v546_v8  ;;  %v360_v46 = vmul.f32 %v329_v43, %v548_v9  ;;  %v357_v47 = vmul.f32 %v325_v44, %v534_v2  ;;  %v358_v48 = vmul.f32 %v325_v44, %v538_v4 }
 0x2d0   :  { %375 = vst [vmem:[#allocation5 + $0x10] sm:$0xff] %v359_v45  ;;  %376 = vst [vmem:[#allocation5 + $0x18] sm:$0xff] %v360_v46 }
 0x2d1   :  { %373 = vst [vmem:[#allocation5] sm:$0xff] %v357_v47  ;;  %374 = vst [vmem:[#allocation5 + $0x8] sm:$0xff] %v358_v48  ;;  %v333_v36 = vpop.permute.xlu1 %332  ;;  %v344_v49 = vpop.permute.xlu0 %343 }
 0x2d2   :  { %v361_v50 = vmul.f32 %v333_v36, %v558_v14  ;;  %v362_v51 = vmul.f32 %v333_v36, %v560_v15  ;;  %v365_v52 = vmul.f32 %v344_v49, %v530_v0  ;;  %v366_v8 = vmul.f32 %v344_v49, %v532_v1 }
 0x2d4   :  { %377 = vst [vmem:[#allocation5 + $0x20] sm:$0xff] %v361_v50  ;;  %378 = vst [vmem:[#allocation5 + $0x28] sm:$0xff] %v362_v51 }
 0x2d5   :  { %381 = vst [vmem:[#allocation5 + $0x40] sm:$0xff] %v365_v52  ;;  %382 = vst [vmem:[#allocation5 + $0x48] sm:$0xff] %v366_v8  ;;  %v337_v2 = vpop.permute.xlu1 %336  ;;  %v352_v4 = vpop.permute.xlu0 %351 }
 0x2d6   :  { %v363_v9 = vmul.f32 %v337_v2, %v570_v20  ;;  %v364_v53 = vmul.f32 %v337_v2, %v572_v21  ;;  %v369_v54 = vmul.f32 %v352_v4, %v554_v12  ;;  %v370_v14 = vmul.f32 %v352_v4, %v556_v13 }
 0x2d8   :  { %379 = vst [vmem:[#allocation5 + $0x30] sm:$0xff] %v363_v9  ;;  %380 = vst [vmem:[#allocation5 + $0x38] sm:$0xff] %v364_v53 }
 0x2d9   :  { %385 = vst [vmem:[#allocation5 + $0x60] sm:$0xff] %v369_v54  ;;  %386 = vst [vmem:[#allocation5 + $0x68] sm:$0xff] %v370_v14  ;;  %v348_v0 = vpop.permute.xlu1 %347 }
 0x2da   :  { %v367_v1 = vmul.f32 %v348_v0, %v540_v5  ;;  %v368_v15 = vmul.f32 %v348_v0, %v542_v6 }
 0x2dc   :  { %383 = vst [vmem:[#allocation5 + $0x50] sm:$0xff] %v367_v1  ;;  %384 = vst [vmem:[#allocation5 + $0x58] sm:$0xff] %v368_v15 }
 0x2dd   :  { %v356_v20 = vpop.permute.xlu1 %355 }
 0x2de   :  { %v371_v21 = vmul.f32 %v356_v20, %v566_v18  ;;  %v372_v12 = vmul.f32 %v356_v20, %v568_v19 }
 0x2e0   :  { %387 = vst [vmem:[#allocation5 + $0x70] sm:$0xff] %v371_v21  ;;  %388 = vst [vmem:[#allocation5 + $0x78] sm:$0xff] %v372_v12 }
 0x2e1   :  { %475 = shalt.err (!%p472_p9)
}
 0x2e2   :  { %400 = dma.vmem_to_hbm [thread:$0]  %s395_s3, 2048, %s634_s5, [#allocation4], %s489_s21, %s489_s21, %s490_s22  }
 0x2e3   :  { %486 = dma.done.wait [#allocation4], 2048  }
 0x2e4   :  { %487 = vsyncadd [#allocation4], 4294965248 }
 0x2e5   :  { %404 = vsyncpa [#allocation3], 1 }
 0x2e6   :  { %405 = vsyncpa [#allocation4], 1 }

</bundles_post_ra>
